<compile_context>
chip_gen: v7x
topology: tpu7x:2x2x1
jax: 0.10.0
libtpu: 0.0.40
codegen_flags: <defaults>
</compile_context>

<pallas_src>
import jax
import jax.numpy as jnp
from jax.experimental import pallas as pl
from jax.experimental.pallas import tpu as pltpu


def _round_up(x, m):
    return -(-x // m) * m


def _round_down(x, m):
    return (x // m) * m


_TILE_BYTES = 8 << 20      # ~8 MiB input block
_MAX_ROW_TILE = 2048       # caps the (r_tile, 1) scale/shift VMEM footprint
_VMEM_LIMIT = 48 << 20     # explicit scoped VMEM (v5e default is only 16 MiB;
                           # v7x physical per-TC VMEM is 64 MiB)


def _normalize_kernel(scale_ref, shift_ref, x_ref, o_ref):
    # y = x * (1/std) + (-mean/std), computed in f32, stored in img dtype.
    x = x_ref[...].astype(jnp.float32)
    o_ref[...] = (x * scale_ref[...] + shift_ref[...]).astype(o_ref.dtype)


def _is_multi_tensorcore():
    # v7x: 2 TensorCores / chip, 64 MiB VMEM per TC.  v5e/v6e: 1 TC, 128 MiB.
    try:
        return pltpu.get_tpu_info().vmem_capacity_bytes <= (64 << 20)
    except Exception:
        return False


def normalization_forward(img, mean, std):
    """Pallas TPU equivalent of PyTorch Normalization: (img - mean[c]) / std[c].

    img: (N, C, H, W) floating point; mean/std: (C,).
    """
    if not jnp.issubdtype(img.dtype, jnp.floating):
        raise TypeError("normalization_forward requires a floating-point image")

    N, C, H, W = img.shape
    dtype = img.dtype
    elem_bytes = img.dtype.itemsize
    sublane = max(8, 32 // elem_bytes)     # 8 (f32), 16 (bf16/f16), 32 (int8)

    rows, P = N * C, H * W
    row_bytes = P * elem_bytes

    # Fused per-row affine (row = n*C + c), kept in float32.
    inv_std = (1.0 / std).astype(jnp.float32)          # (C,)
    shift = (-mean / std).astype(jnp.float32)          # (C,)
    scale_rows = jnp.tile(inv_std, N).reshape(rows, 1)
    shift_rows = jnp.tile(shift, N).reshape(rows, 1)

    # Lane-dense 2-D slab; NCHW is row-major so this reshape is a free view.
    x2d = img.reshape(rows, P)

    r_min = min(rows, sublane)
    if r_min * row_bytes <= _TILE_BYTES:
        # ---- Common path: full-width column tile, 1-D grid over rows -------
        c_tile = P                                  # == full dim -> no padding
        r_budget = max(sublane, _round_down(_TILE_BYTES // max(row_bytes, 1),
                                            sublane))
        r_budget = min(r_budget, _MAX_ROW_TILE)
        r_tile = rows if r_budget >= rows else r_budget
        n_steps = pl.cdiv(rows, r_tile)

        # Keep >= 2 row steps on a multi-TC chip for problems big enough to
        # care, so each TensorCore streams half of the HBM traffic.
        if (n_steps == 1 and rows >= 2 * sublane
                and rows * row_bytes >= (2 << 20) and _is_multi_tensorcore()):
            r_tile = _round_up(pl.cdiv(rows, 2), sublane)
            n_steps = pl.cdiv(rows, r_tile)

        grid = (n_steps,)
        in_specs = [
            pl.BlockSpec((r_tile, 1), lambda i: (i, 0)),        # scale
            pl.BlockSpec((r_tile, 1), lambda i: (i, 0)),        # shift
            pl.BlockSpec((r_tile, c_tile), lambda i: (i, 0)),   # img slab
        ]
        out_spec = pl.BlockSpec((r_tile, c_tile), lambda i: (i, 0))
        dim_sem = ("parallel",)
    else:
        # ---- Very wide rows (huge spatial dims): tile lanes too, x128 ------
        r_tile = r_min
        c_tile = max(128, _round_down(_TILE_BYTES // (r_tile * elem_bytes), 128))
        grid = (pl.cdiv(rows, r_tile), pl.cdiv(P, c_tile))
        in_specs = [
            pl.BlockSpec((r_tile, 1), lambda i, j: (i, 0)),
            pl.BlockSpec((r_tile, 1), lambda i, j: (i, 0)),
            pl.BlockSpec((r_tile, c_tile), lambda i, j: (i, j)),
        ]
        out_spec = pl.BlockSpec((r_tile, c_tile), lambda i, j: (i, j))
        dim_sem = ("parallel", "parallel")

    out2d = pl.pallas_call(
        _normalize_kernel,
        out_shape=jax.ShapeDtypeStruct((rows, P), dtype),
        grid=grid,
        in_specs=in_specs,
        out_specs=out_spec,
        compiler_params=pltpu.CompilerParams(
            dimension_semantics=dim_sem,
            vmem_limit_bytes=_VMEM_LIMIT),
        cost_estimate=pl.CostEstimate(
            flops=2 * rows * P,
            transcendentals=0,
            bytes_accessed=2 * rows * P * elem_bytes),
    )(scale_rows, shift_rows, x2d)

    # TODO(synk): optionally pass input_output_aliases={2: 0} when the caller
    # can donate `img` (halves peak HBM footprint; img is needed here for the
    # reference check, so it is not donated).
    return out2d.reshape(N, C, H, W)


if __name__ == "__main__":
    # Per-channel normalization constants (standard ImageNet values),
    # matching Normalization(mean, std) with .view(-1, 1, 1) broadcast.
    mean = jnp.array([0.485, 0.456, 0.406], dtype=jnp.float32)
    std = jnp.array([0.229, 0.224, 0.225], dtype=jnp.float32)

    key = jax.random.PRNGKey(0)
    img = jax.random.uniform(key, (2, 3, 16, 16), dtype=jnp.float32)

    out = normalization_forward(img, mean, std)
    out = jax.block_until_ready(out)

    # Reference: plain JAX broadcasting, same semantics as the PyTorch module.
    ref = (img - mean[None, :, None, None]) / std[None, :, None, None]
    assert out.shape == img.shape and out.dtype == img.dtype
    assert jnp.allclose(out, ref, rtol=1e-5, atol=1e-6)

    print("KERNEL_OK")
</pallas_src>

<mosaic_0001>
module attributes {stable_mosaic.version = 11 : i64} {
  func.func @_normalize_kernel(%arg0: i32, %arg1: memref<6x1xf32, #tpu.memory_space<vmem>>, %arg2: memref<6x1xf32, #tpu.memory_space<vmem>>, %arg3: memref<6x256xf32, #tpu.memory_space<vmem>>, %arg4: memref<6x256xf32, #tpu.memory_space<vmem>>) attributes {dimension_semantics = [#tpu.dimension_semantics<parallel>], iteration_bounds = array<i64: 1>, scalar_prefetch = 0 : i64, scratch_operands = 0 : i64, tpu.core_type = #tpu.core_type<tc>, window_params = [{transform_indices = @transform_0, window_bounds = array<i64: 6, 1>}, {transform_indices = @transform_1, window_bounds = array<i64: 6, 1>}, {transform_indices = @transform_2, window_bounds = array<i64: 6, 256>}, {transform_indices = @transform_3, window_bounds = array<i64: 6, 256>}]} {
    %c0 = arith.constant 0 : index
    %c0_0 = arith.constant 0 : index
    %0 = vector.load %arg3[%c0, %c0_0] : memref<6x256xf32, #tpu.memory_space<vmem>>, vector<6x256xf32>
    %c0_1 = arith.constant 0 : index
    %c0_2 = arith.constant 0 : index
    %1 = vector.load %arg1[%c0_1, %c0_2] : memref<6x1xf32, #tpu.memory_space<vmem>>, vector<6x1xf32>
    %2 = vector.broadcast %1 : vector<6x1xf32> to vector<6x256xf32>
    %3 = arith.mulf %0, %2 : vector<6x256xf32>
    %c0_3 = arith.constant 0 : index
    %c0_4 = arith.constant 0 : index
    %4 = vector.load %arg2[%c0_3, %c0_4] : memref<6x1xf32, #tpu.memory_space<vmem>>, vector<6x1xf32>
    %5 = vector.broadcast %4 : vector<6x1xf32> to vector<6x256xf32>
    %6 = arith.addf %3, %5 : vector<6x256xf32>
    %c0_5 = arith.constant 0 : index
    %c0_6 = arith.constant 0 : index
    %7 = vector.load %arg4[%c0_5, %c0_6] : memref<6x256xf32, #tpu.memory_space<vmem>>, vector<6x256xf32>
    tpu.vector_store %arg4[%c0_5, %c0_6], %6 {strides = array<i32>} : memref<6x256xf32, #tpu.memory_space<vmem>>, vector<6x256xf32>,
    return
  }
  func.func @transform_0(%arg0: i32) -> (i32, i32) {
    %c0_i32 = arith.constant 0 : i32
    %c0_i32_0 = arith.constant 0 : i32
    return %arg0, %c0_i32 : i32, i32
  }
  func.func @transform_1(%arg0: i32) -> (i32, i32) {
    %c0_i32 = arith.constant 0 : i32
    %c0_i32_0 = arith.constant 0 : i32
    return %arg0, %c0_i32 : i32, i32
  }
  func.func @transform_2(%arg0: i32) -> (i32, i32) {
    %c0_i32 = arith.constant 0 : i32
    %c0_i32_0 = arith.constant 0 : i32
    return %arg0, %c0_i32 : i32, i32
  }
  func.func @transform_3(%arg0: i32) -> (i32, i32) {
    %c0_i32 = arith.constant 0 : i32
    %c0_i32_0 = arith.constant 0 : i32
    return %arg0, %c0_i32 : i32, i32
  }
}

</mosaic_0001>

<bundles_post_ra>
// kernel: tpu_custom_call.1
= control target key start
LH: loop header
LB: loop body
LE: loop exit
PB: predicated region body
PF: predicated region fallthrough
CT: control target
= control target key end

     0   :  { %v76_v1 = vmov 0   ;;  %s122_s0 = inlined_call_operand.vmem [shape: f32[6,1], index: 0, kind: input, shape index: {}]   ;;  %s123_s1 = inlined_call_operand.vmem [shape: f32[6,1], index: 1, kind: input, shape index: {}]   ;;  %s124_s2 = inlined_call_operand.vmem [shape: f32[6,256], index: 2, kind: input, shape index: {}]   ;;  %s125_s3 = inlined_call_operand.hbm [shape: f32[6,256], index: 3, kind: output, shape index: {}]  }
   0x1   :  { %v17_v0 = vld [vmem:[%s122_s0] sm:$0x3f]  ;;  %51 = vset.pattern.permute.xlu0 %v76_v1 }
   0x2   :  { %8 = vsyncpa [#allocation3], 0  ;;  %20 = vperm.xlu0 %51, %v17_v0   ;;  %v25_v2 = vld [vmem:[%s123_s1] sm:$0x3f]  ;;  %v16_v5 = vld [vmem:[%s124_s2 + $0x8] sm:$0x3f] }
   0x3   :  { %v15_v4 = vld [vmem:[%s124_s2] sm:$0x3f]  ;;  %s77_s20 = smov [#allocation2]  }
   0x4   :  { %s41_s0 = sshll.u32 %s77_s20, 4  ;;  %s42_s0 = int_to_ptr.vmem [resolvable:$true] %s41_s0 }
   0x5   :  { %s52_s1 = scalar_lea.vmem %s42_s0, 256  ;;  %p57_p1 = scmp.lt.s32.totalorder %s42_s0, %s42_s0 }
   0x6   :  { %28 = vperm.xlu0 %51, %v25_v2   ;;  %p53_p0 = scmp.ne.s32.totalorder %s42_s0, %s52_s1  ;;  %p58_p2 = scmp.lt.s32.totalorder %s52_s1, %s52_s1 }
   0x8   :  { %p59_p3 = por %p58_p2, %p57_p1 }
   0xa   :  { %p60_p4 = pnand %p59_p3, %p53_p0 }
  0x81   :  { %v21_v3 = vpop.permute.xlu0 %20 }
  0x82   :  { %v23_v6 = vmul.f32 %v21_v3, %v15_v4  ;;  %v24_v7 = vmul.f32 %v21_v3, %v16_v5 }
  0x85   :  { %v29_v8 = vpop.permute.xlu0 %28 }
  0x86   :  { %v31_v9 = vadd.f32 %v29_v8, %v23_v6  ;;  %v32_v10 = vadd.f32 %v29_v8, %v24_v7 }
  0x88   :  { %33 = vst [vmem:[#allocation2] sm:$0x3f] %v31_v9  ;;  %34 = vst [vmem:[#allocation2 + $0x8] sm:$0x3f] %v32_v10 }
  0x89   :  { %63 = shalt.err (!%p60_p4)
}
  0x8a   :  { %s64_s2 = scalar_lea.hbm %s125_s3, 256 }
  0x8b   :  { %p65_p5 = scmp.ne.s32.totalorder %s125_s3, %s64_s2  ;;  %p68_p6 = scmp.lt.u32.totalorder %s64_s2, %s125_s3 }
  0x8d   :  { %p70_p7 = pnand %p68_p6, %p65_p5 }
  0x8f   :  { %73 = shalt.err (!%p70_p7)
}
  0x90   :  { %44 = dma.vmem_to_hbm [thread:$0]  %s42_s0, 256, %s125_s3, [#allocation3]  }
  0x91   :  { %74 = dma.done.wait [#allocation3], 256  }
  0x92   :  { %75 = vsyncadd [#allocation3], 4294967040 }
  0x93   :  { %48 = vsyncpa [#allocation3], 1 }

</bundles_post_ra>
